<compile_context>
chip_gen: v7x
topology: tpu7x:2x2x1
jax: 0.10.0
libtpu: 0.0.40
codegen_flags: <defaults>
</compile_context>

<pallas_src>
import jax
import jax.numpy as jnp
from jax.experimental import pallas as pl
from jax.experimental.pallas import tpu as pltpu


def _fused_matmul_kernel(x_ref, w_ref, z_ref, o_ref, acc_ref):
    """acc += X_tile @ W_tile on the MXU; add z-bias row and store at last K step."""
    k = pl.program_id(2)

    @pl.when(k == 0)
    def _():
        acc_ref[...] = jnp.zeros_like(acc_ref)

    acc_ref[...] += jnp.dot(x_ref[...], w_ref[...],
                            preferred_element_type=jnp.float32)

    @pl.when(k == pl.num_programs(2) - 1)
    def _():
        o_ref[...] = (acc_ref[...] + z_ref[...]).astype(o_ref.dtype)


def _round_up(x, m):
    return ((x + m - 1) // m) * m


def _pick_tile(dim, tile, align):
    """Return (padded_dim, effective_tile).

    If dim fits in one tile, use a single full-width tile padded only to
    `align` (a full-extent block dim is exempt from the (8,128) rule when
    align==1).  Otherwise pad dim to a multiple of `tile` (tile is assumed to
    already be a multiple of `align`)."""
    if dim <= tile:
        t = _round_up(dim, align)
        return t, t
    return _round_up(dim, tile), tile


def _pad2d(a, rows, cols):
    pr, pc = rows - a.shape[0], cols - a.shape[1]
    if pr or pc:
        a = jnp.pad(a, ((0, pr), (0, pc)))
    return a


def complex_linear_noise(x_r, x_i, w_r, w_i, key,
                         real_w_var=0.000169, img_w_var=1.09e-05,
                         real_noise_var=0.000169, img_noise_var=1.09e-05,
                         *,
                         tm=256, tn=512, tk=512,        # on v5e prefer tm=128
                         compute_dtype=jnp.bfloat16,
                         return_noisy_params=False):
    """w_r, w_i: (out_features, in_features) (PyTorch nn.Linear convention)."""
    out_f, in_f = w_r.shape
    assert w_i.shape == (out_f, in_f)
    B = x_r.shape[0]
    assert x_r.shape == (B, in_f) and x_i.shape == (B, in_f)

    keys = jax.random.split(key, 8)
    r_w_std = jnp.sqrt(jnp.float32(real_w_var))
    i_w_std = jnp.sqrt(jnp.float32(img_w_var))
    r_n_std = jnp.sqrt(jnp.float32(real_noise_var))
    i_n_std = jnp.sqrt(jnp.float32(img_noise_var))

    # Independent weight-noise draw per LinearNoise.forward call.
    # fc_r is called twice (on x_r and x_i) and fc_i twice -> 4 draws.
    wr1 = w_r + jax.random.normal(keys[0], w_r.shape, jnp.float32) * r_w_std
    wr2 = w_r + jax.random.normal(keys[1], w_r.shape, jnp.float32) * r_w_std
    wi1 = w_i + jax.random.normal(keys[2], w_i.shape, jnp.float32) * i_w_std
    wi2 = w_i + jax.random.normal(keys[3], w_i.shape, jnp.float32) * i_w_std

    # Independent output-noise z per call; combined into one (1, 2*out_f) row.
    zr1 = jax.random.normal(keys[4], (1, out_f), jnp.float32) * r_n_std
    zr2 = jax.random.normal(keys[5], (1, out_f), jnp.float32) * r_n_std
    zi1 = jax.random.normal(keys[6], (1, out_f), jnp.float32) * i_n_std
    zi2 = jax.random.normal(keys[7], (1, out_f), jnp.float32) * i_n_std
    z_fused = jnp.concatenate([zr1 - zi1, zr2 + zi2], axis=1)  # (1, 2*out_f) f32

    # Fuse 4 matmuls into one:
    #   [x_r | x_i] @ [[Wr1^T, Wi2^T], [-Wi1^T, Wr2^T]]
    #     = [x_r@Wr1^T - x_i@Wi1^T | x_r@Wi2^T + x_i@Wr2^T]
    w_top = jnp.concatenate([wr1.T, wi2.T], axis=1)
    w_bot = jnp.concatenate([-wi1.T, wr2.T], axis=1)
    w_fused = jnp.concatenate([w_top, w_bot], axis=0).astype(compute_dtype)  # (2*in_f, 2*out_f)
    x_fused = jnp.concatenate([x_r, x_i], axis=1).astype(compute_dtype)      # (B, 2*in_f)

    K = 2 * in_f
    N = 2 * out_f

    M_pad, tm_eff = _pick_tile(B, tm, 8)      # sublane-aligned batch tile
    N_pad, tn_eff = _pick_tile(N, tn, 128)    # lane-dense output stores
    K_pad, tk_eff = _pick_tile(K, tk, 1)      # single full-K tile unless K > tk

    xp = _pad2d(x_fused, M_pad, K_pad)
    wp = _pad2d(w_fused, K_pad, N_pad)
    zp = _pad2d(z_fused, 1, N_pad)

    grid = (M_pad // tm_eff, N_pad // tn_eff, K_pad // tk_eff)

    cost = pl.CostEstimate(
        flops=2 * M_pad * K_pad * N_pad,
        transcendentals=0,
        bytes_accessed=(xp.size * xp.dtype.itemsize
                        + wp.size * wp.dtype.itemsize
                        + zp.size * zp.dtype.itemsize
                        + M_pad * N_pad * 4))

    out = pl.pallas_call(
        _fused_matmul_kernel,
        out_shape=jax.ShapeDtypeStruct((M_pad, N_pad), jnp.float32),
        grid_spec=pltpu.PrefetchScalarGridSpec(
            num_scalar_prefetch=0,
            grid=grid,
            in_specs=[
                pl.BlockSpec((tm_eff, tk_eff), lambda i, j, k: (i, k)),   # X
                pl.BlockSpec((tk_eff, tn_eff), lambda i, j, k: (k, j)),   # W
                pl.BlockSpec((1, tn_eff), lambda i, j, k: (0, j)),        # z row
            ],
            out_specs=pl.BlockSpec((tm_eff, tn_eff), lambda i, j, k: (i, j)),
            scratch_shapes=[pltpu.VMEM((tm_eff, tn_eff), jnp.float32)]),
        compiler_params=pltpu.CompilerParams(
            dimension_semantics=("parallel", "parallel", "arbitrary")),
        cost_estimate=cost,
    )(xp, wp, zp)

    out_r = out[:B, :out_f]
    out_i = out[:B, out_f:N]

    if return_noisy_params:
        # Test-only: returning these forces extra HBM materialization.
        return out_r, out_i, (x_fused, w_fused, z_fused)
    return out_r, out_i


if __name__ == "__main__":
    # Small deterministic setup: batch=16, in_features=32, out_features=32.
    B, IN_F, OUT_F = 16, 32, 32
    root = jax.random.PRNGKey(0)
    k_xr, k_xi, k_wr, k_wi, k_noise = jax.random.split(root, 5)

    x_r = jax.random.normal(k_xr, (B, IN_F), dtype=jnp.float32)
    x_i = jax.random.normal(k_xi, (B, IN_F), dtype=jnp.float32)

    # Deterministic weight init (kaiming-uniform-like: U(-1/sqrt(in), 1/sqrt(in))).
    bound = 1.0 / jnp.sqrt(jnp.float32(IN_F))
    w_r = jax.random.uniform(k_wr, (OUT_F, IN_F), jnp.float32, -bound, bound)
    w_i = jax.random.uniform(k_wi, (OUT_F, IN_F), jnp.float32, -bound, bound)

    out_r, out_i, aux = complex_linear_noise(
        x_r, x_i, w_r, w_i, k_noise, return_noisy_params=True)
    out_r = jax.block_until_ready(out_r)
    out_i = jax.block_until_ready(out_i)

    # Reference using the exact same (noisy, dtype-cast) operands as the kernel.
    x_fused, w_fused, z_fused = aux
    ref = jnp.dot(x_fused, w_fused, preferred_element_type=jnp.float32) + z_fused
    ref_r, ref_i = ref[:, :OUT_F], ref[:, OUT_F:]

    assert out_r.shape == (B, OUT_F) and out_i.shape == (B, OUT_F)
    assert jnp.allclose(out_r, ref_r, atol=1e-4, rtol=1e-4), "real part mismatch"
    assert jnp.allclose(out_i, ref_i, atol=1e-4, rtol=1e-4), "imag part mismatch"

    print("KERNEL_OK")
</pallas_src>

<mosaic_0001>
module attributes {stable_mosaic.version = 11 : i64} {
  func.func @_fused_matmul_kernel(%arg0: i32, %arg1: i32, %arg2: i32, %arg3: memref<16x64xbf16, #tpu.memory_space<vmem>>, %arg4: memref<64x128xbf16, #tpu.memory_space<vmem>>, %arg5: memref<1x128xf32, #tpu.memory_space<vmem>>, %arg6: memref<16x128xf32, #tpu.memory_space<vmem>>, %arg7: memref<16x128xf32, #tpu.memory_space<vmem>>) attributes {dimension_semantics = [#tpu.dimension_semantics<parallel>, #tpu.dimension_semantics<parallel>, #tpu.dimension_semantics<arbitrary>], iteration_bounds = array<i64: 1, 1, 1>, scalar_prefetch = 0 : i64, scratch_operands = 1 : i64, tpu.core_type = #tpu.core_type<tc>, window_params = [{transform_indices = @transform_0, window_bounds = array<i64: 16, 64>}, {transform_indices = @transform_1, window_bounds = array<i64: 64, 128>}, {transform_indices = @transform_2, window_bounds = array<i64: 1, 128>}, {transform_indices = @transform_3, window_bounds = array<i64: 16, 128>}]} {
    %c0_i32 = arith.constant 0 : i32
    %0 = arith.cmpi eq, %arg2, %c0_i32 : i32
    %1 = arith.extui %0 : i1 to i32
    %c0_i32_0 = arith.constant 0 : i32
    %2 = arith.cmpi ne, %1, %c0_i32_0 : i32
    scf.if %2 {
      %cst_10 = arith.constant 0.000000e+00 : f32
      %12 = vector.broadcast %cst_10 : f32 to vector<16x128xf32>
      %c0_11 = arith.constant 0 : index
      %c0_12 = arith.constant 0 : index
      %13 = vector.load %arg7[%c0_11, %c0_12] : memref<16x128xf32, #tpu.memory_space<vmem>>, vector<16x128xf32>
      tpu.vector_store %arg7[%c0_11, %c0_12], %12 {strides = array<i32>} : memref<16x128xf32, #tpu.memory_space<vmem>>, vector<16x128xf32>,
    } else {
    }
    %c0 = arith.constant 0 : index
    %c0_1 = arith.constant 0 : index
    %3 = vector.load %arg7[%c0, %c0_1] : memref<16x128xf32, #tpu.memory_space<vmem>>, vector<16x128xf32>
    %c0_2 = arith.constant 0 : index
    %c0_3 = arith.constant 0 : index
    %4 = vector.load %arg3[%c0_2, %c0_3] : memref<16x64xbf16, #tpu.memory_space<vmem>>, vector<16x64xbf16>
    %c0_4 = arith.constant 0 : index
    %c0_5 = arith.constant 0 : index
    %5 = vector.load %arg4[%c0_4, %c0_5] : memref<64x128xbf16, #tpu.memory_space<vmem>>, vector<64x128xbf16>
    %cst = arith.constant dense<0.000000e+00> : vector<16x128xf32>
    %6 = tpu.matmul %4, %5, %cst {dimension_numbers = #tpu.dot_dimension_numbers<[1], [0], [0], [1], [0, 0, 1, 1], [], []>} : vector<16x64xbf16>, vector<64x128xbf16>, vector<16x128xf32> -> vector<16x128xf32>
    %7 = arith.addf %3, %6 : vector<16x128xf32>
    %c0_6 = arith.constant 0 : index
    %c0_7 = arith.constant 0 : index
    %8 = vector.load %arg7[%c0_6, %c0_7] : memref<16x128xf32, #tpu.memory_space<vmem>>, vector<16x128xf32>
    tpu.vector_store %arg7[%c0_6, %c0_7], %7 {strides = array<i32>} : memref<16x128xf32, #tpu.memory_space<vmem>>, vector<16x128xf32>,
    %c0_i32_8 = arith.constant 0 : i32
    %9 = arith.cmpi eq, %arg2, %c0_i32_8 : i32
    %10 = arith.extui %9 : i1 to i32
    %c0_i32_9 = arith.constant 0 : i32
    %11 = arith.cmpi ne, %10, %c0_i32_9 : i32
    scf.if %11 {
      %c0_10 = arith.constant 0 : index
      %c0_11 = arith.constant 0 : index
      %12 = vector.load %arg7[%c0_10, %c0_11] : memref<16x128xf32, #tpu.memory_space<vmem>>, vector<16x128xf32>
      %c0_12 = arith.constant 0 : index
      %c0_13 = arith.constant 0 : index
      %13 = vector.load %arg5[%c0_12, %c0_13] : memref<1x128xf32, #tpu.memory_space<vmem>>, vector<1x128xf32>
      %14 = vector.broadcast %13 : vector<1x128xf32> to vector<16x128xf32>
      %15 = arith.addf %12, %14 : vector<16x128xf32>
      %c0_14 = arith.constant 0 : index
      %c0_15 = arith.constant 0 : index
      %16 = vector.load %arg6[%c0_14, %c0_15] : memref<16x128xf32, #tpu.memory_space<vmem>>, vector<16x128xf32>
      tpu.vector_store %arg6[%c0_14, %c0_15], %15 {strides = array<i32>} : memref<16x128xf32, #tpu.memory_space<vmem>>, vector<16x128xf32>,
    } else {
    }
    return
  }
  func.func @transform_0(%arg0: i32, %arg1: i32, %arg2: i32) -> (i32, i32) {
    %c0_i32 = arith.constant 0 : i32
    return %arg0, %arg2 : i32, i32
  }
  func.func @transform_1(%arg0: i32, %arg1: i32, %arg2: i32) -> (i32, i32) {
    %c0_i32 = arith.constant 0 : i32
    return %arg2, %arg1 : i32, i32
  }
  func.func @transform_2(%arg0: i32, %arg1: i32, %arg2: i32) -> (i32, i32) {
    %c0_i32 = arith.constant 0 : i32
    %c0_i32_0 = arith.constant 0 : i32
    return %c0_i32, %arg1 : i32, i32
  }
  func.func @transform_3(%arg0: i32, %arg1: i32, %arg2: i32) -> (i32, i32) {
    %c0_i32 = arith.constant 0 : i32
    return %arg0, %arg1 : i32, i32
  }
}

</mosaic_0001>

<bundles_post_ra>
// kernel: tpu_custom_call.1
= control target key start
LH: loop header
LB: loop body
LE: loop exit
PB: predicated region body
PF: predicated region fallthrough
CT: control target
= control target key end

     0   :  { %8 = vsyncpa [#allocation4], 0  ;;  %s352_s0 = inlined_call_operand.hbm [shape: bf16[16,64], index: 0, kind: input, shape index: {}]   ;;  %s353_s1 = inlined_call_operand.hbm [shape: bf16[64,128], index: 1, kind: input, shape index: {}]   ;;  %s354_s2 = inlined_call_operand.vmem [shape: f32[1,128], index: 2, kind: input, shape index: {}]   ;;  %s355_s3 = inlined_call_operand.hbm [shape: f32[16,128], index: 3, kind: output, shape index: {}]  }
   0x1   :  { %9 = vsyncpa [#allocation7], 0 }
   0x2   :  { %10 = vsyncpa [#allocation5], 0  ;;  %s284_s12 = smov [#allocation3]   ;;  %s212_s16 = scalar_lea.hbm %s352_s0, 128 }
   0x3   :  { %s16_s13 = sshll.u32 %s284_s12, 4  ;;  %p213_p0 = scmp.ne.s32.totalorder %s352_s0, %s212_s16  ;;  %s17_s13 = int_to_ptr.vmem [resolvable:$true] %s16_s13 }
   0x4   :  { %p216_p1 = scmp.lt.u32.totalorder %s212_s16, %s352_s0 }
   0x6   :  { %p218_p2 = pnand %p216_p1, %p213_p0 }
   0x8   :  { %221 = shalt.err (!%p218_p2)
}
   0x9   :  { %s222_s21 = scalar_lea.vmem %s17_s13, 128  ;;  %p227_p4 = scmp.lt.s32.totalorder %s17_s13, %s17_s13 }
   0xa   :  { %p223_p3 = scmp.ne.s32.totalorder %s17_s13, %s222_s21  ;;  %p228_p5 = scmp.lt.s32.totalorder %s222_s21, %s222_s21 }
   0xc   :  { %p229_p6 = por %p228_p5, %p227_p4 }
   0xe   :  { %p230_p7 = pnand %p229_p6, %p223_p3 }
  0x10   :  { %233 = shalt.err (!%p230_p7)
}
  0x11   :  { %s285_s22 = smov 64   ;;  %s286_s23 = smov 4  }
  0x12   :  { %22 = dma.hbm_to_vmem [thread:$0]  %s352_s0, 128, %s17_s13, [#allocation4], %s285_s22, %s285_s22, %s286_s23  }
  0x13   :  { %s287_s26 = smov [#allocation6]   ;;  %s234_s30 = scalar_lea.hbm %s353_s1, 512 }
  0x14   :  { %s28_s27 = sshll.u32 %s287_s26, 4  ;;  %p235_p8 = scmp.ne.s32.totalorder %s353_s1, %s234_s30  ;;  %s29_s27 = int_to_ptr.vmem [resolvable:$true] %s28_s27 }
  0x15   :  { %p238_p9 = scmp.lt.u32.totalorder %s234_s30, %s353_s1 }
  0x17   :  { %p240_p10 = pnand %p238_p9, %p235_p8 }
  0x19   :  { %243 = shalt.err (!%p240_p10)
}
  0x1a   :  { %s244_s8 = scalar_lea.vmem %s29_s27, 512  ;;  %p249_p12 = scmp.lt.s32.totalorder %s29_s27, %s29_s27 }
  0x1b   :  { %p245_p11 = scmp.ne.s32.totalorder %s29_s27, %s244_s8  ;;  %p250_p13 = scmp.lt.s32.totalorder %s244_s8, %s244_s8 }
  0x1d   :  { %p251_p0 = por %p250_p13, %p249_p12 }
  0x1f   :  { %p252_p1 = pnand %p251_p0, %p245_p11 }
  0x21   :  { %255 = shalt.err (!%p252_p1)
}
  0x22   :  { %34 = dma.hbm_to_vmem [thread:$0]  %s353_s1, 512, %s29_s27, [#allocation7], %s285_s22, %s285_s22, %s286_s23  }
  0x23   :  { %278 = dma.done.wait [#allocation4], 128  }
  0x24   :  { %279 = vsyncadd [#allocation4], 4294967168 }
  0x25   :  { %280 = dma.done.wait [#allocation7], 512  }
  0x26   :  { %281 = vsyncadd [#allocation7], 4294966784  ;;  %v288_v0 = vmov 0.0   ;;  %vm289_vm0 = vmmov 0   ;;  %v207_v1 = vld [vmem:[#allocation6] sm:$0xff]   ;;  %v208_v2 = vld [vmem:[#allocation6 + $0x8] sm:$0xff]  }
  0x27   :  { %186 = vmatprep.subr.bf16.mxu0 %v288_v0  ;;  %194 = vmatprep.mubr.msk.bf16.mxu0 %vm289_vm0, %v288_v0  ;;  %v209_v3 = vld [vmem:[#allocation6 + $0x10] sm:$0xff]   ;;  %v210_v4 = vld [vmem:[#allocation6 + $0x18] sm:$0xff]   ;;  %vm91_vm1 = vcmask 523264   ;;  %s290_s11 = smov [#allocation8]  }
  0x28   :  { %187 = vmatpush3.bf16.msra.mxu0 %v207_v1  ;;  %v211_v5 = vld [vmem:[#allocation3] sm:$0xff]   ;;  %s161_s12 = sshll.u32 %s290_s11, 4  ;;  %s162_s12 = int_to_ptr.vmem [resolvable:$true] %s161_s12 }
  0x29   :  { %188 = vmatprep.subr.bf16.mxu0 %v288_v0  ;;  %v180_v6 = vld [vmem:[%s354_s2] ss:$0 sm:$0xff]  ;;  %s256_s13 = scalar_lea.vmem %s162_s12, 256  ;;  %p261_p3 = scmp.lt.s32.totalorder %s162_s12, %s162_s12 }
  0x2a   :  { %p257_p2 = scmp.ne.s32.totalorder %s162_s12, %s256_s13  ;;  %p262_p4 = scmp.lt.s32.totalorder %s256_s13, %s256_s13 }
  0x2c   :  { %189 = vmatpush3.bf16.msra.mxu0 %v208_v2  ;;  %p263_p5 = por %p262_p4, %p261_p3 }
  0x2d   :  { %190 = vmatprep.subr.bf16.mxu0 %v288_v0 }
  0x2e   :  { %p264_p6 = pnand %p263_p5, %p257_p2 }
  0x30   :  { %191 = vmatpush3.bf16.msra.mxu0 %v209_v3 }
  0x31   :  { %192 = vmatprep.subr.bf16.mxu0 %v288_v0 }
  0x34   :  { %193 = vmatpush3.bf16.msra.mxu0 %v210_v4 }
  0x37   :  { %195 = vmatmul.mubr.msk.bf16.vlgmr.msra.gmra.mrb[0].mxu0 %vm91_vm1, %v211_v5 }
 0x10a   :  { %v129_v7 = vpop.f32.mrb[0].mxu0 }
 0x10b   :  { %v152_v8 = vadd.f32 %v180_v6, %v129_v7  ;;  %v196_v9 = vpop.f32.mrb[1].mxu0 }
 0x10c   :  { %v132_v10 = vpop.f32.mrb[2].mxu0 }
 0x10d   :  { %154 = vst [vmem:[#allocation8] sm:$0xff] %v152_v8  ;;  %v153_v11 = vadd.f32 %v180_v6, %v132_v10  ;;  %v197_v12 = vpop.f32.mrb[3].mxu0 }
 0x10f   :  { %155 = vst [vmem:[#allocation8 + $0x8] sm:$0xff] %v153_v11 }
 0x110   :  { %267 = shalt.err (!%p264_p6)
}
 0x111   :  { %s268_s15 = scalar_lea.hbm %s355_s3, 256 }
 0x112   :  { %p269_p7 = scmp.ne.s32.totalorder %s355_s3, %s268_s15  ;;  %p272_p8 = scmp.lt.u32.totalorder %s268_s15, %s355_s3 }
 0x114   :  { %p274_p9 = pnand %p272_p8, %p269_p7 }
 0x116   :  { %277 = shalt.err (!%p274_p9)
}
 0x117   :  { %s291_s20 = smov 128   ;;  %s292_s21 = smov 8  }
 0x118   :  { %167 = dma.vmem_to_hbm [thread:$0]  %s162_s12, 256, %s355_s3, [#allocation5], %s291_s20, %s291_s20, %s292_s21  }
 0x119   :  { %282 = dma.done.wait [#allocation5], 256  }
 0x11a   :  { %283 = vsyncadd [#allocation5], 4294967040 }
 0x11b   :  { %171 = vsyncpa [#allocation4], 1 }
 0x11c   :  { %172 = vsyncpa [#allocation7], 1 }
 0x11d   :  { %173 = vsyncpa [#allocation5], 1 }

</bundles_post_ra>
